<compile_context>
chip_gen: v7x
topology: tpu7x:2x2x1
jax: 0.10.0
libtpu: 0.0.40
codegen_flags: <defaults>
</compile_context>

<pallas_src>
import functools

import jax
import jax.numpy as jnp
import numpy as np
from jax.experimental import pallas as pl
from jax.experimental.pallas import tpu as pltpu


# ----------------------------- kernels --------------------------------------


def _logits_kernel(x_ref, wt_ref, b_ref, attt_ref, col_ref):
    """col = tanh(x @ wt + b) @ att_t for one flattened row tile.

    x_ref:    (R, Dp)   flattened (view*node) rows of embeds
    wt_ref:   (Dp, Dp)  bf16 fc weight, pre-transposed (y = x @ wt + b)
    b_ref:    (1, Dp)   f32 fc bias (broadcast once per tile)
    attt_ref: (Dp, 1)   bf16 semantic-attention vector (column)
    col_ref:  (R, 1)    f32 per-row projection <tanh(fc(x)), att>
    """
    h = jnp.dot(x_ref[...].astype(jnp.bfloat16), wt_ref[...],
                preferred_element_type=jnp.float32)      # one big MXU matmul / tile
    h = jnp.tanh(h + b_ref[...])                         # f32 elementwise
    # TODO(synk): if a v6e/v7x bundle dump shows the EUP slot saturating on tanh,
    # replace jnp.tanh with a VPU polynomial approximation.
    col_ref[...] = jnp.dot(h.astype(jnp.bfloat16), attt_ref[...],
                           preferred_element_type=jnp.float32)


def _weighted_sum_kernel(beta_ref, x_ref, z_ref, *, num_views):
    """z = sum_m beta[m] * x[m] for one node tile.

    beta_ref: SMEM (M,) f32 softmaxed view weights
    x_ref:    (M, TN, Dp) embeds tile
    z_ref:    (TN, Dp) f32 output tile
    """
    # Accumulate straight into the VMEM-resident output block -> bounded
    # accumulator (no full-tile f32 value chained across the unrolled M loop).
    z_ref[...] = beta_ref[0] * x_ref[0]
    for m in range(1, num_views):
        z_ref[...] += beta_ref[m] * x_ref[m]


# ----------------------------- wrapper ---------------------------------------


def _round_up(x, m):
    return ((x + m - 1) // m) * m


def _node_tile(M, N, Dp, itemsize):
    # Kernel-B node tile.  Budget ~8 MiB for the double-buffered (M, TN, Dp)
    # input block so it fits the default scoped-VMEM limit on v5e/v6e/v7x
    # (v7x: 64 MiB physical / 32 MiB scoped) with headroom.
    cap = (8 * 1024 * 1024) // max(1, 2 * M * Dp * itemsize)
    tn = min(512, N, max(cap, 8))
    tn = max(8, (tn // 8) * 8)
    if tn >= 256:           # v6e/v7x MXU-friendly / roofline-friendly multiple
        tn = (tn // 256) * 256
    return tn


def _flat_row_tile(total_rows):
    # Kernel-A tile over the flattened (view*node) rows: one big matmul per
    # grid step (>=256 rows keeps the 256-wide v6e/v7x MXU full).  Must divide
    # the (8-aligned) total so the grid covers it exactly.
    if total_rows <= 1024:
        return total_rows
    for cand in (1024, 512, 256, 128, 64, 32, 16, 8):
        if total_rows % cand == 0:
            return cand
    return 8  # unreachable: total_rows is always a multiple of 8


def aggregator_forward(embeds, w, b, att):
    """embeds: (M, N, D); w: fc.weight (out, in) torch convention; b: (D,); att: (1, D)."""
    M, N, D = embeds.shape
    Dp = _round_up(D, 128)                       # lane-dense hidden dim
    itemsize = jnp.dtype(embeds.dtype).itemsize
    TN = _node_tile(M, N, Dp, itemsize)          # pass-B node tile
    Npad = _round_up(N, TN)

    # --- wrapper-side layout plumbing (free XLA pads / reshapes) ------------
    x3 = embeds
    if (Npad, Dp) != (N, D):
        x3 = jnp.pad(x3, ((0, 0), (0, Npad - N), (0, Dp - D)))
    xflat = x3.reshape(M * Npad, Dp)

    wt = jnp.pad(jnp.asarray(w).T, ((0, Dp - D), (0, Dp - D))).astype(jnp.bfloat16)
    b2 = jnp.pad(jnp.asarray(b, jnp.float32).reshape(1, D), ((0, 0), (0, Dp - D)))
    att_t = jnp.pad(jnp.asarray(att, jnp.float32).reshape(1, D),
                    ((0, 0), (0, Dp - D))).T.astype(jnp.bfloat16)   # (Dp, 1)

    # --- Pass A: fused per-row projection <tanh(fc(x)), att> ----------------
    Rtot = M * Npad
    R = _flat_row_tile(Rtot)
    cost_a = pl.CostEstimate(
        flops=2 * Rtot * Dp * Dp + 2 * Rtot * Dp,
        transcendentals=Rtot * Dp,
        bytes_accessed=Rtot * Dp * itemsize + Dp * Dp * 2 + Dp * 6 + Rtot * 4,
    )
    col = pl.pallas_call(
        _logits_kernel,
        out_shape=jax.ShapeDtypeStruct((Rtot, 1), jnp.float32),
        grid=(Rtot // R,),
        in_specs=[
            pl.BlockSpec((R, Dp), lambda i: (i, 0)),
            pl.BlockSpec((Dp, Dp), lambda i: (0, 0)),
            pl.BlockSpec((1, Dp), lambda i: (0, 0)),
            pl.BlockSpec((Dp, 1), lambda i: (0, 0)),
        ],
        out_specs=pl.BlockSpec((R, 1), lambda i: (i, 0)),
        compiler_params=pltpu.CompilerParams(dimension_semantics=("parallel",)),
        cost_estimate=cost_a,
    )(xflat, wt, b2, att_t)

    # Per-view mean over the TRUE N nodes (padded rows sliced off -> exact),
    # then the trivial M-way softmax.  attn_drop is identity in eval mode.
    # TODO(synk): nn.Dropout(attn_drop) on att (train-mode) is not implemented.
    logits = col.reshape(M, Npad)[:, :N].mean(axis=1)          # (M,) f32
    betas = jax.nn.softmax(logits)                             # (M,) f32

    # --- Pass B: z = sum_m beta_m * embeds_m, tiled over nodes --------------
    cost_b = pl.CostEstimate(
        flops=2 * M * Npad * Dp,
        transcendentals=0,
        bytes_accessed=M * Npad * Dp * itemsize + Npad * Dp * 4 + M * 4,
    )
    z_pad = pl.pallas_call(
        functools.partial(_weighted_sum_kernel, num_views=M),
        out_shape=jax.ShapeDtypeStruct((Npad, Dp), jnp.float32),
        grid=(Npad // TN,),
        in_specs=[
            pl.BlockSpec(memory_space=pltpu.MemorySpace.SMEM),   # betas (M,)
            pl.BlockSpec((M, TN, Dp), lambda i: (0, i, 0)),
        ],
        out_specs=pl.BlockSpec((TN, Dp), lambda i: (i, 0)),
        compiler_params=pltpu.CompilerParams(dimension_semantics=("parallel",)),
        cost_estimate=cost_b,
    )(betas, x3)
    return z_pad[:N, :D]


# ----------------------------- reference & test ------------------------------


def _xavier_normal(key, shape, gain):
    fan_out, fan_in = shape
    std = gain * np.sqrt(2.0 / (fan_in + fan_out))
    return std * jax.random.normal(key, shape, dtype=jnp.float32)


def reference_forward(embeds, w, b, att):
    sp = jnp.tanh(embeds @ w.T + b).mean(axis=1)            # (M, D)
    beta = att @ sp.T                                       # (1, M)
    beta = jax.nn.softmax(beta, axis=1).reshape(-1, 1, 1)   # (M, 1, 1)
    return (beta * embeds).sum(axis=0)                      # (N, D)


if __name__ == "__main__":
    M, N, D = 4, 16, 32  # views, nodes, hidden_dim
    key = jax.random.PRNGKey(0)
    k_x, k_w, k_b, k_a = jax.random.split(key, 4)

    embeds = jax.random.normal(k_x, (M, N, D), dtype=jnp.float32)

    gain = 1.414
    fc_w = _xavier_normal(k_w, (D, D), gain)                 # torch (out, in)
    bound = 1.0 / np.sqrt(D)
    fc_b = jax.random.uniform(k_b, (D,), jnp.float32, -bound, bound)
    att = _xavier_normal(k_a, (1, D), gain)

    z = aggregator_forward(embeds, fc_w, fc_b, att)
    z = jax.block_until_ready(z)

    z_ref = reference_forward(embeds, fc_w, fc_b, att)
    # bf16 MXU inputs (f32 accumulation) slightly perturb logits/betas,
    # so tolerances are loosened vs. a pure-f32 comparison.
    np.testing.assert_allclose(np.asarray(z), np.asarray(z_ref), rtol=3e-2, atol=3e-2)

    print("KERNEL_OK")
</pallas_src>

<mosaic_0001>
module attributes {stable_mosaic.version = 11 : i64} {
  func.func @_logits_kernel(%arg0: i32, %arg1: memref<64x128xf32, #tpu.memory_space<vmem>>, %arg2: memref<128x128xbf16, #tpu.memory_space<vmem>>, %arg3: memref<1x128xf32, #tpu.memory_space<vmem>>, %arg4: memref<128x1xbf16, #tpu.memory_space<vmem>>, %arg5: memref<64x1xf32, #tpu.memory_space<vmem>>) attributes {dimension_semantics = [#tpu.dimension_semantics<parallel>], iteration_bounds = array<i64: 1>, scalar_prefetch = 0 : i64, scratch_operands = 0 : i64, tpu.core_type = #tpu.core_type<tc>, window_params = [{transform_indices = @transform_0, window_bounds = array<i64: 64, 128>}, {pipeline_mode = #tpu.pipeline_mode<synchronous>, transform_indices = @transform_1, window_bounds = array<i64: 128, 128>}, {pipeline_mode = #tpu.pipeline_mode<synchronous>, transform_indices = @transform_2, window_bounds = array<i64: 1, 128>}, {pipeline_mode = #tpu.pipeline_mode<synchronous>, transform_indices = @transform_3, window_bounds = array<i64: 128, 1>}, {transform_indices = @transform_4, window_bounds = array<i64: 64, 1>}]} {
    %c0 = arith.constant 0 : index
    %c0_0 = arith.constant 0 : index
    %0 = vector.load %arg1[%c0, %c0_0] : memref<64x128xf32, #tpu.memory_space<vmem>>, vector<64x128xf32>
    %1 = arith.truncf %0 : vector<64x128xf32> to vector<64x128xbf16>
    %c0_1 = arith.constant 0 : index
    %c0_2 = arith.constant 0 : index
    %2 = vector.load %arg2[%c0_1, %c0_2] : memref<128x128xbf16, #tpu.memory_space<vmem>>, vector<128x128xbf16>
    %cst = arith.constant dense<0.000000e+00> : vector<64x128xf32>
    %3 = tpu.matmul %1, %2, %cst {dimension_numbers = #tpu.dot_dimension_numbers<[1], [0], [0], [1], [0, 0, 1, 1], [], []>} : vector<64x128xbf16>, vector<128x128xbf16>, vector<64x128xf32> -> vector<64x128xf32>
    %c0_3 = arith.constant 0 : index
    %c0_4 = arith.constant 0 : index
    %4 = vector.load %arg3[%c0_3, %c0_4] : memref<1x128xf32, #tpu.memory_space<vmem>>, vector<1x128xf32>
    %5 = vector.broadcast %4 : vector<1x128xf32> to vector<64x128xf32>
    %6 = arith.addf %3, %5 : vector<64x128xf32>
    %7 = math.tanh %6 : vector<64x128xf32>
    %8 = arith.truncf %7 : vector<64x128xf32> to vector<64x128xbf16>
    %c0_5 = arith.constant 0 : index
    %c0_6 = arith.constant 0 : index
    %9 = vector.load %arg4[%c0_5, %c0_6] : memref<128x1xbf16, #tpu.memory_space<vmem>>, vector<128x1xbf16>
    %cst_7 = arith.constant dense<0.000000e+00> : vector<64x1xf32>
    %10 = tpu.matmul %8, %9, %cst_7 {dimension_numbers = #tpu.dot_dimension_numbers<[1], [0], [0], [1], [0, 0, 1, 1], [], []>} : vector<64x128xbf16>, vector<128x1xbf16>, vector<64x1xf32> -> vector<64x1xf32>
    %c0_8 = arith.constant 0 : index
    %c0_9 = arith.constant 0 : index
    %11 = vector.load %arg5[%c0_8, %c0_9] : memref<64x1xf32, #tpu.memory_space<vmem>>, vector<64x1xf32>
    tpu.vector_store %arg5[%c0_8, %c0_9], %10 {strides = array<i32>} : memref<64x1xf32, #tpu.memory_space<vmem>>, vector<64x1xf32>,
    return
  }
  func.func @transform_0(%arg0: i32) -> (i32, i32) {
    %c0_i32 = arith.constant 0 : i32
    %c0_i32_0 = arith.constant 0 : i32
    return %arg0, %c0_i32 : i32, i32
  }
  func.func @transform_1(%arg0: i32) -> (i32, i32) {
    %c0_i32 = arith.constant 0 : i32
    %c0_i32_0 = arith.constant 0 : i32
    %c0_i32_1 = arith.constant 0 : i32
    return %c0_i32, %c0_i32_0 : i32, i32
  }
  func.func @transform_2(%arg0: i32) -> (i32, i32) {
    %c0_i32 = arith.constant 0 : i32
    %c0_i32_0 = arith.constant 0 : i32
    %c0_i32_1 = arith.constant 0 : i32
    return %c0_i32, %c0_i32_0 : i32, i32
  }
  func.func @transform_3(%arg0: i32) -> (i32, i32) {
    %c0_i32 = arith.constant 0 : i32
    %c0_i32_0 = arith.constant 0 : i32
    %c0_i32_1 = arith.constant 0 : i32
    return %c0_i32, %c0_i32_0 : i32, i32
  }
  func.func @transform_4(%arg0: i32) -> (i32, i32) {
    %c0_i32 = arith.constant 0 : i32
    %c0_i32_0 = arith.constant 0 : i32
    return %arg0, %c0_i32 : i32, i32
  }
}

</mosaic_0001>

<bundles_post_ra>
// kernel: tpu_custom_call.1
= control target key start
LH: loop header
LB: loop body
LE: loop exit
PB: predicated region body
PF: predicated region fallthrough
CT: control target
= control target key end

     0   :  { %9 = vsyncpa [#allocation3], 0  ;;  %s483_s15 = smov [#allocation2]   ;;  %s606_s0 = inlined_call_operand.vmem [shape: f32[64,128], index: 0, kind: input, shape index: {}]   ;;  %s607_s1 = inlined_call_operand.hbm [shape: bf16[128,128], index: 1, kind: input, shape index: {}]   ;;  %s608_s2 = inlined_call_operand.vmem [shape: f32[1,128], index: 2, kind: input, shape index: {}]   ;;  %s609_s3 = inlined_call_operand.vmem [shape: bf16[128,1], index: 3, kind: input, shape index: {}]   ;;  %s610_s4 = inlined_call_operand.vmem [shape: f32[64,1], index: 4, kind: output, shape index: {}]  }
   0x1   :  { %s17_s16 = sshll.u32 %s483_s15, 4  ;;  %s459_s19 = scalar_lea.hbm %s607_s1, 1024  ;;  %s18_s16 = int_to_ptr.vmem [resolvable:$true] %s17_s16 }
   0x2   :  { %p460_p0 = scmp.ne.s32.totalorder %s607_s1, %s459_s19  ;;  %p463_p1 = scmp.lt.u32.totalorder %s459_s19, %s607_s1 }
   0x4   :  { %p465_p2 = pnand %p463_p1, %p460_p0 }
   0x6   :  { %468 = shalt.err (!%p465_p2)
}
   0x7   :  { %s469_s24 = scalar_lea.vmem %s18_s16, 1024  ;;  %p474_p4 = scmp.lt.s32.totalorder %s18_s16, %s18_s16 }
   0x8   :  { %p470_p3 = scmp.ne.s32.totalorder %s18_s16, %s469_s24  ;;  %p475_p5 = scmp.lt.s32.totalorder %s469_s24, %s469_s24 }
   0xa   :  { %p476_p6 = por %p475_p5, %p474_p4 }
   0xc   :  { %p477_p7 = pnand %p476_p6, %p470_p3 }
   0xe   :  { %480 = shalt.err (!%p477_p7)
}
   0xf   :  { %s484_s25 = smov 64   ;;  %s485_s26 = smov 4  }
  0x10   :  { %23 = dma.hbm_to_vmem [thread:$0]  %s607_s1, 1024, %s18_s16, [#allocation3], %s484_s25, %s484_s25, %s485_s26  }
  0x11   :  { %481 = dma.done.wait [#allocation3], 1024  }
  0x12   :  { %482 = vsyncadd [#allocation3], 4294966272  ;;  %v427_v0 = vld [vmem:[#allocation2] sm:$0xff]   ;;  %v428_v1 = vld [vmem:[#allocation2 + $0x8] sm:$0xff]   ;;  %vm321_vm0 = vcmask 7168  }
  0x13   :  { %376 = vmatprep.subr.bf16.mxu0 %v427_v0  ;;  %v429_v2 = vld [vmem:[#allocation2 + $0x10] sm:$0xff]   ;;  %v430_v3 = vld [vmem:[#allocation2 + $0x18] sm:$0xff]   ;;  %v32_v4 = vld [vmem:[%s606_s0] sm:$0xff] }
  0x14   :  { %377 = vmatpush3.bf16.msra.mxu0 %v427_v0  ;;  %v33_v5 = vld [vmem:[%s606_s0 + $0x8] sm:$0xff]  ;;  %v431_v7 = vld [vmem:[#allocation2 + $0x20] sm:$0xff]   ;;  %v437_v10 = vld [vmem:[%s609_s3 + $0x10] sm:$0xff]  }
  0x15   :  { %378 = vmatprep.subr.bf16.mxu0 %v428_v1  ;;  %v40_v6 = vpack.c.bf16 %v33_v5, %v32_v4  ;;  %v435_v8 = vld [vmem:[%s609_s3] sm:$0xff]   ;;  %v436_v9 = vld [vmem:[%s609_s3 + $0x8] sm:$0xff]   ;;  %v433_v12 = vld [vmem:[#allocation2 + $0x30] sm:$0xff]  }
  0x16   :  { %400 = vmatprep.subr.bf16.mxu1 %v435_v8  ;;  %v432_v11 = vld [vmem:[#allocation2 + $0x28] sm:$0xff]   ;;  %v434_v13 = vld [vmem:[#allocation2 + $0x38] sm:$0xff]   ;;  %v34_v14 = vld [vmem:[%s606_s0 + $0x10] sm:$0xff] }
  0x17   :  { %392 = vmatprep.mubr.bf16.mxu0 %v40_v6  ;;  %401 = vmatpush3.bf16.msra.mxu1 %v435_v8  ;;  %v35_v15 = vld [vmem:[%s606_s0 + $0x18] sm:$0xff]  ;;  %v36_v16 = vld [vmem:[%s606_s0 + $0x20] sm:$0xff]  ;;  %v37_v17 = vld [vmem:[%s606_s0 + $0x28] sm:$0xff] }
  0x18   :  { %379 = vmatpush3.bf16.msra.mxu0 %v428_v1  ;;  %402 = vmatprep.subr.bf16.mxu1 %v436_v9  ;;  %v41_v18 = vpack.c.bf16 %v35_v15, %v34_v14  ;;  %v42_v19 = vpack.c.bf16 %v37_v17, %v36_v16  ;;  %v38_v20 = vld [vmem:[%s606_s0 + $0x30] sm:$0xff]  ;;  %v39_v21 = vld [vmem:[%s606_s0 + $0x38] sm:$0xff]  ;;  %v439_v24 = vld [vmem:[%s609_s3 + $0x20] sm:$0xff]  }
  0x19   :  { %380 = vmatprep.subr.bf16.mxu0 %v429_v2  ;;  %v43_v22 = vpack.c.bf16 %v39_v21, %v38_v20  ;;  %v438_v23 = vld [vmem:[%s609_s3 + $0x18] sm:$0xff]   ;;  %v440_v25 = vld [vmem:[%s609_s3 + $0x28] sm:$0xff]   ;;  %v441_v26 = vld [vmem:[%s609_s3 + $0x30] sm:$0xff]  }
  0x1a   :  { %v442_v27 = vld [vmem:[%s609_s3 + $0x38] sm:$0xff]   ;;  %v335_v28 = vld [vmem:[%s608_s2] ss:$0 sm:$0xff] }
  0x1b   :  { %403 = vmatpush3.bf16.msra.mxu1 %v436_v9 }
  0x1c   :  { %381 = vmatpush3.bf16.msra.mxu0 %v429_v2  ;;  %404 = vmatprep.subr.bf16.mxu1 %v437_v10 }
  0x1d   :  { %382 = vmatprep.subr.bf16.mxu0 %v430_v3 }
  0x1f   :  { %405 = vmatpush3.bf16.msra.mxu1 %v437_v10 }
  0x20   :  { %383 = vmatpush3.bf16.msra.mxu0 %v430_v3  ;;  %406 = vmatprep.subr.bf16.mxu1 %v438_v23 }
  0x21   :  { %384 = vmatprep.subr.bf16.mxu0 %v431_v7 }
  0x23   :  { %407 = vmatpush3.bf16.msra.mxu1 %v438_v23 }
  0x24   :  { %385 = vmatpush3.bf16.msra.mxu0 %v431_v7  ;;  %408 = vmatprep.subr.bf16.mxu1 %v439_v24 }
  0x25   :  { %386 = vmatprep.subr.bf16.mxu0 %v432_v11 }
  0x27   :  { %409 = vmatpush3.bf16.msra.mxu1 %v439_v24 }
  0x28   :  { %387 = vmatpush3.bf16.msra.mxu0 %v432_v11  ;;  %410 = vmatprep.subr.bf16.mxu1 %v440_v25 }
  0x29   :  { %388 = vmatprep.subr.bf16.mxu0 %v433_v12 }
  0x2b   :  { %411 = vmatpush3.bf16.msra.mxu1 %v440_v25 }
  0x2c   :  { %389 = vmatpush3.bf16.msra.mxu0 %v433_v12  ;;  %412 = vmatprep.subr.bf16.mxu1 %v441_v26 }
  0x2d   :  { %390 = vmatprep.subr.bf16.mxu0 %v434_v13 }
  0x2f   :  { %413 = vmatpush3.bf16.msra.mxu1 %v441_v26 }
  0x30   :  { %391 = vmatpush3.bf16.msra.mxu0 %v434_v13  ;;  %414 = vmatprep.subr.bf16.mxu1 %v442_v27 }
  0x33   :  { %393 = vmatmul.mubr.bf16.vlgmr.msra.gmra.mrb[0].mxu0 %v41_v18  ;;  %415 = vmatpush3.bf16.msra.mxu1 %v442_v27 }
  0x34   :  { %396 = vmatprep.mubr.bf16.mxu0 %v42_v19 }
  0x3b   :  { %397 = vmatmul.mubr.bf16.gmra.mrb[4].mxu0 %v43_v22 }
 0x106   :  { %v394_v29 = vpop.f32.mrb[0].mxu0 }
 0x107   :  { %v158_v30 = vadd.f32 %v394_v29, %v335_v28  ;;  %v149_v31 = vpop.f32.mrb[1].mxu0 }
 0x108   :  { %v150_v32 = vadd.f32 %v335_v28, %v149_v31  ;;  %v395_v33 = vpop.f32.mrb[2].mxu0 }
 0x109   :  { %443 = vtanh.f32 %v158_v30  ;;  %v161_v34 = vadd.f32 %v395_v33, %v335_v28  ;;  %v152_v35 = vpop.f32.mrb[3].mxu0 }
 0x10a   :  { %445 = vtanh.f32 %v150_v32  ;;  %v153_v36 = vadd.f32 %v335_v28, %v152_v35 }
 0x10b   :  { %447 = vtanh.f32 %v161_v34 }
 0x10c   :  { %449 = vtanh.f32 %v153_v36 }
 0x10e   :  { %v398_v37 = vpop.f32.mrb[4].mxu0 }
 0x10f   :  { %v174_v38 = vadd.f32 %v398_v37, %v335_v28  ;;  %v165_v39 = vpop.f32.mrb[5].mxu0 }
 0x110   :  { %v166_v40 = vadd.f32 %v335_v28, %v165_v39  ;;  %v399_v41 = vpop.f32.mrb[6].mxu0 }
 0x111   :  { %451 = vtanh.f32 %v174_v38  ;;  %v177_v42 = vadd.f32 %v399_v41, %v335_v28  ;;  %v168_v43 = vpop.f32.mrb[7].mxu0 }
 0x112   :  { %453 = vtanh.f32 %v166_v40  ;;  %v169_v44 = vadd.f32 %v335_v28, %v168_v43 }
 0x113   :  { %v444_v45 = vpop.eup %443  ;;  %455 = vtanh.f32 %v177_v42 }
 0x114   :  { %v446_v46 = vpop.eup %445  ;;  %457 = vtanh.f32 %v169_v44 }
 0x115   :  { %v448_v47 = vpop.eup %447 }
 0x116   :  { %v450_v48 = vpop.eup %449  ;;  %v189_v49 = vpack.c.bf16 %v448_v47, %v444_v45 }
 0x117   :  { %v188_v50 = vpack.c.bf16 %v450_v48, %v446_v46 }
 0x119   :  { %416 = vmatprep.mubr.bf16.mxu1 %v188_v50 }
 0x11a   :  { %417 = vmatmul.mubr.bf16.vlgmr.msra.gmra.mrb[0].mxu1 %v189_v49 }
 0x11b   :  { %v452_v51 = vpop.eup %451 }
 0x11c   :  { %v454_v52 = vpop.eup %453 }
 0x11d   :  { %v456_v53 = vpop.eup %455 }
 0x11e   :  { %v458_v54 = vpop.eup %457  ;;  %v191_v55 = vpack.c.bf16 %v456_v53, %v452_v51 }
 0x11f   :  { %v190_v56 = vpack.c.bf16 %v458_v54, %v454_v52 }
 0x121   :  { %420 = vmatprep.mubr.bf16.mxu1 %v190_v56 }
 0x122   :  { %421 = vmatmul.mubr.bf16.gmra.mrb[4].mxu1 %v191_v55 }
 0x1ed   :  { %v418_v57 = vpop.f32.mrb[0].mxu1 }
 0x1ee   :  { %324 = vst.msk [vmem:[%s610_s4 + $0x10] sm:$0xff] %vm321_vm0, %v418_v57  ;;  %v290_v58 = vpop.f32.mrb[1].mxu1 }
 0x1ef   :  { %322 = vst.msk [vmem:[%s610_s4] sm:$0xff] %vm321_vm0, %v290_v58  ;;  %v419_v59 = vpop.f32.mrb[2].mxu1 }
 0x1f0   :  { %325 = vst.msk [vmem:[%s610_s4 + $0x18] sm:$0xff] %vm321_vm0, %v419_v59  ;;  %v293_v60 = vpop.f32.mrb[3].mxu1 }
 0x1f1   :  { %323 = vst.msk [vmem:[%s610_s4 + $0x8] sm:$0xff] %vm321_vm0, %v293_v60 }
 0x1f5   :  { %v422_v61 = vpop.f32.mrb[4].mxu1 }
 0x1f6   :  { %328 = vst.msk [vmem:[%s610_s4 + $0x30] sm:$0xff] %vm321_vm0, %v422_v61  ;;  %v306_v62 = vpop.f32.mrb[5].mxu1 }
 0x1f7   :  { %326 = vst.msk [vmem:[%s610_s4 + $0x20] sm:$0xff] %vm321_vm0, %v306_v62  ;;  %v423_v63 = vpop.f32.mrb[6].mxu1 }
 0x1f8   :  { %329 = vst.msk [vmem:[%s610_s4 + $0x38] sm:$0xff] %vm321_vm0, %v423_v63  ;;  %v309_v0 = vpop.f32.mrb[7].mxu1 }
 0x1f9   :  { %327 = vst.msk [vmem:[%s610_s4 + $0x28] sm:$0xff] %vm321_vm0, %v309_v0 }
 0x1fa   :  { %334 = vsyncpa [#allocation3], 1 }

</bundles_post_ra>
